<compile_context>
chip_gen: v7x
topology: tpu7x:2x2x1
jax: 0.10.0
libtpu: 0.0.40
codegen_flags: <defaults>
</compile_context>

<pallas_src>
import functools

import jax
import jax.numpy as jnp
from jax.experimental import pallas as pl
from jax.experimental.pallas import tpu as pltpu


def _round_up(x, m):
    return ((x + m - 1) // m) * m


def class_embedding_kernel(labels_ref, tables_ref, out_ref, *, C, D, P, DC_pad):
    # labels_ref: (TBp, P*D)          int32    blocked over the batch grid
    # tables_ref: (P*DC_pad, M_lane)  bf16/f32 full-array VMEM resident
    # out_ref:    (TBp, M_lane)       float32  lane-dense packed output tile
    labels = labels_ref[...]
    TBp = labels.shape[0]

    # Packed one-hot, built as P lane-aligned sub-blocks of width DC_pad.
    # Sub-block j one-hots the D labels of packed slot j:
    #   onehot[r, j*DC_pad + d*C + labels[r, j*D + d]] = 1
    # Compares/ORs stay in int32/bool; a single cast per 128-lane block feeds
    # the MXU (so v5e never does emulated bf16 vector math).
    k_iota = jax.lax.broadcasted_iota(jnp.int32, (TBp, DC_pad), 1)
    blocks = []
    for j in range(P):                         # D, P small & static -> unrolled
        hit = None
        for d in range(D):
            flat = labels[:, j * D + d:j * D + d + 1] + d * C   # (TBp, 1)
            m = k_iota == flat
            hit = m if hit is None else jnp.logical_or(hit, m)
        blocks.append(hit.astype(tables_ref.dtype))
    onehot = jnp.concatenate(blocks, axis=-1) if P > 1 else blocks[0]

    # out[r, :] = onehot[r, :] @ block_diag(tables)   (MXU, f32 accumulation)
    # TODO(synk): could emit bf16 here for another 2x writeback cut if the
    # downstream consumer tolerates it; kept f32 to match the PyTorch module.
    out_ref[...] = jnp.dot(onehot, tables_ref[...],
                           preferred_element_type=jnp.float32)


def class_embedding_forward(class_labels, tables, *, use_bf16_tables=True):
    """Forward pass of ClassEmbedding.

    class_labels: (B, D, K) int -- only [..., 0] is used (matches the PyTorch
                  forward); (B, D) and (B,) inputs are also accepted.
    tables:       (D, C_max, M) float32 stacked, zero-padded embedding tables.
    Returns:      (B, M) float32.
    """
    # --- normalize labels to (B, D) int32 -----------------------------------
    if class_labels.ndim == 1:
        labels = class_labels[:, None]
    elif class_labels.ndim == 2:
        labels = class_labels
    else:
        labels = class_labels[:, :, 0]
    labels = labels.astype(jnp.int32)
    # TODO(synk): out-of-range / negative labels silently contribute zeros here
    # (labels >= C_max never match any one-hot lane inside their own block),
    # whereas torch.nn.Embedding would raise an index error.

    B, D = labels.shape
    Dt, C, M = tables.shape
    assert Dt == D, (Dt, D)

    # --- output packing: P batch rows per 128-lane output row ---------------
    if M <= 128 and 128 % M == 0:
        P = 128 // M
        M_lane = 128                      # fully lane-dense, zero padding cols
    else:
        P = 1
        M_lane = _round_up(M, 128)        # fallback: pad N (masked stores)

    DC = D * C
    DC_pad = _round_up(DC, 128)           # lane-aligned per-slot one-hot width

    tab_dtype = jnp.bfloat16 if use_bf16_tables else jnp.float32
    tables_2d = tables.reshape(DC, M).astype(tab_dtype)
    # Block-diagonal slab: tables replicated on the diagonal so one MXU matmul
    # emits P packed batch rows per lane-dense output row.
    slab = jnp.zeros((P * DC_pad, M_lane), tab_dtype)
    for j in range(P):
        slab = slab.at[j * DC_pad:j * DC_pad + DC, j * M:j * M + M].set(tables_2d)

    # --- batch tiling --------------------------------------------------------
    Bp = -(-B // P)                                    # packed batch rows
    # Aim for >=2 grid steps (so v7x's two TensorCores both get work), capped
    # at 256 packed rows (= P*256 original rows) per step; multiple of 8.
    TBp = max(8, min(256, _round_up(-(-Bp // 2), 8)))
    Bp_pad = _round_up(Bp, TBp)
    B_pad = Bp_pad * P

    labels_p = jnp.pad(labels, ((0, B_pad - B), (0, 0)))   # pad rows: label 0
    labels_packed = labels_p.reshape(Bp_pad, P * D)        # slot j = cols j*D:(j+1)*D

    grid = (Bp_pad // TBp,)

    cost = pl.CostEstimate(
        flops=2 * Bp_pad * (P * DC_pad) * M_lane,
        transcendentals=0,
        bytes_accessed=(labels_packed.size * 4
                        + slab.size * slab.dtype.itemsize
                        + Bp_pad * M_lane * 4),
    )

    out_padded = pl.pallas_call(
        functools.partial(class_embedding_kernel, C=C, D=D, P=P, DC_pad=DC_pad),
        out_shape=jax.ShapeDtypeStruct((Bp_pad, M_lane), jnp.float32),
        grid_spec=pltpu.PrefetchScalarGridSpec(
            num_scalar_prefetch=0,
            grid=grid,
            in_specs=[
                # Labels tile: (TBp, P*D); last dim equals the full array dim.
                pl.BlockSpec((TBp, P * D), lambda i: (i, 0)),
                # Grid-invariant tables slab: whole array resident in VMEM,
                # single-buffered (no pipeline bookkeeping for a constant block).
                pl.BlockSpec(memory_space=pltpu.MemorySpace.VMEM),
            ],
            out_specs=pl.BlockSpec((TBp, M_lane), lambda i: (i, 0)),
        ),
        compiler_params=pltpu.CompilerParams(
            dimension_semantics=("parallel",),            # megacore sharding
        ),
        cost_estimate=cost,
    )(labels_packed, slab)

    # Unpack: row r, cols j*M:(j+1)*M  ->  original batch row r*P + j.
    if P > 1:
        return out_padded.reshape(Bp_pad * P, M)[:B]
    return out_padded[:B, :M]


if __name__ == "__main__":
    # Module config: 5 condition dimensions, output_dim=32, per-dim class counts.
    num_condition_dimensions = 5
    output_dim = 32
    num_classes_per_dimension = [7, 5, 9, 4, 6]
    C_max = 16  # padded common class count

    key = jax.random.PRNGKey(0)
    k_tab, k_lab = jax.random.split(key)

    # Deterministic parameter init: nn.Embedding default is N(0, 1) per weight.
    table_keys = jax.random.split(k_tab, num_condition_dimensions)
    tables = jnp.zeros((num_condition_dimensions, C_max, output_dim), jnp.float32)
    for d in range(num_condition_dimensions):
        w = jax.random.normal(table_keys[d],
                              (num_classes_per_dimension[d], output_dim),
                              dtype=jnp.float32)
        tables = tables.at[d, :num_classes_per_dimension[d], :].set(w)

    # Example inputs: class_labels of shape (B, D, K); forward uses [:, :, 0].
    B, K = 2, 3
    lab_keys = jax.random.split(k_lab, num_condition_dimensions)
    cols = [jax.random.randint(lab_keys[d], (B, K), 0, num_classes_per_dimension[d])
            for d in range(num_condition_dimensions)]
    class_labels = jnp.stack(cols, axis=1).astype(jnp.int32)  # (B, D, K)

    out = class_embedding_forward(class_labels, tables)
    out = jax.block_until_ready(out)

    # Pure-JAX reference: sum of per-dimension gathers.  Tables are rounded to
    # bf16 for apples-to-apples comparison with the bf16-input MXU matmul
    # (accumulation is f32 in both paths, one-hot entries are exact in bf16).
    tab_cmp = tables.astype(jnp.bfloat16).astype(jnp.float32)
    labels_ref = class_labels[:, :, 0]
    ref = jnp.zeros((B, output_dim), jnp.float32)
    for d in range(num_condition_dimensions):
        ref = ref + tab_cmp[d][labels_ref[:, d]]

    assert out.shape == (B, output_dim), out.shape
    assert jnp.allclose(out, ref, atol=1e-4), (out, ref)
    print("KERNEL_OK")
</pallas_src>

<mosaic_0001>
module attributes {stable_mosaic.version = 11 : i64} {
  func.func @class_embedding_kernel(%arg0: i32, %arg1: memref<8x20xi32, #tpu.memory_space<vmem>>, %arg2: memref<512x128xbf16, #tpu.memory_space<vmem>>, %arg3: memref<8x128xf32, #tpu.memory_space<vmem>>) attributes {dimension_semantics = [#tpu.dimension_semantics<parallel>], iteration_bounds = array<i64: 1>, scalar_prefetch = 0 : i64, scratch_operands = 0 : i64, tpu.core_type = #tpu.core_type<tc>, window_params = [{transform_indices = @transform_0, window_bounds = array<i64: 8, 20>}, {pipeline_mode = #tpu.pipeline_mode<synchronous>, transform_indices = @transform_1, window_bounds = array<i64: 512, 128>}, {transform_indices = @transform_2, window_bounds = array<i64: 8, 128>}]} {
    %c0 = arith.constant 0 : index
    %c0_0 = arith.constant 0 : index
    %0 = vector.load %arg1[%c0, %c0_0] : memref<8x20xi32, #tpu.memory_space<vmem>>, vector<8x20xi32>
    %1 = tpu.iota {dimensions = array<i32: 1>} : vector<8x128xi32>
    %2 = vector.extract_strided_slice %0 {offsets = [0, 0], sizes = [8, 1], strides = [1, 1]} : vector<8x20xi32> to vector<8x1xi32>
    %c0_i32 = arith.constant 0 : i32
    %3 = vector.broadcast %c0_i32 : i32 to vector<8x1xi32>
    %4 = arith.addi %2, %3 : vector<8x1xi32>
    %5 = vector.broadcast %4 : vector<8x1xi32> to vector<8x128xi32>
    %6 = arith.cmpi eq, %1, %5 : vector<8x128xi32>
    %7 = vector.extract_strided_slice %0 {offsets = [0, 1], sizes = [8, 1], strides = [1, 1]} : vector<8x20xi32> to vector<8x1xi32>
    %c16_i32 = arith.constant 16 : i32
    %8 = vector.broadcast %c16_i32 : i32 to vector<8x1xi32>
    %9 = arith.addi %7, %8 : vector<8x1xi32>
    %10 = vector.broadcast %9 : vector<8x1xi32> to vector<8x128xi32>
    %11 = arith.cmpi eq, %1, %10 : vector<8x128xi32>
    %12 = arith.ori %6, %11 : vector<8x128xi1>
    %13 = vector.extract_strided_slice %0 {offsets = [0, 2], sizes = [8, 1], strides = [1, 1]} : vector<8x20xi32> to vector<8x1xi32>
    %c32_i32 = arith.constant 32 : i32
    %14 = vector.broadcast %c32_i32 : i32 to vector<8x1xi32>
    %15 = arith.addi %13, %14 : vector<8x1xi32>
    %16 = vector.broadcast %15 : vector<8x1xi32> to vector<8x128xi32>
    %17 = arith.cmpi eq, %1, %16 : vector<8x128xi32>
    %18 = arith.ori %12, %17 : vector<8x128xi1>
    %19 = vector.extract_strided_slice %0 {offsets = [0, 3], sizes = [8, 1], strides = [1, 1]} : vector<8x20xi32> to vector<8x1xi32>
    %c48_i32 = arith.constant 48 : i32
    %20 = vector.broadcast %c48_i32 : i32 to vector<8x1xi32>
    %21 = arith.addi %19, %20 : vector<8x1xi32>
    %22 = vector.broadcast %21 : vector<8x1xi32> to vector<8x128xi32>
    %23 = arith.cmpi eq, %1, %22 : vector<8x128xi32>
    %24 = arith.ori %18, %23 : vector<8x128xi1>
    %25 = vector.extract_strided_slice %0 {offsets = [0, 4], sizes = [8, 1], strides = [1, 1]} : vector<8x20xi32> to vector<8x1xi32>
    %c64_i32 = arith.constant 64 : i32
    %26 = vector.broadcast %c64_i32 : i32 to vector<8x1xi32>
    %27 = arith.addi %25, %26 : vector<8x1xi32>
    %28 = vector.broadcast %27 : vector<8x1xi32> to vector<8x128xi32>
    %29 = arith.cmpi eq, %1, %28 : vector<8x128xi32>
    %30 = arith.ori %24, %29 : vector<8x128xi1>
    %31 = arith.extui %30 : vector<8x128xi1> to vector<8x128xi32>
    %32 = arith.sitofp %31 : vector<8x128xi32> to vector<8x128xf32>
    %33 = arith.truncf %32 : vector<8x128xf32> to vector<8x128xbf16>
    %34 = vector.extract_strided_slice %0 {offsets = [0, 5], sizes = [8, 1], strides = [1, 1]} : vector<8x20xi32> to vector<8x1xi32>
    %c0_i32_1 = arith.constant 0 : i32
    %35 = vector.broadcast %c0_i32_1 : i32 to vector<8x1xi32>
    %36 = arith.addi %34, %35 : vector<8x1xi32>
    %37 = vector.broadcast %36 : vector<8x1xi32> to vector<8x128xi32>
    %38 = arith.cmpi eq, %1, %37 : vector<8x128xi32>
    %39 = vector.extract_strided_slice %0 {offsets = [0, 6], sizes = [8, 1], strides = [1, 1]} : vector<8x20xi32> to vector<8x1xi32>
    %c16_i32_2 = arith.constant 16 : i32
    %40 = vector.broadcast %c16_i32_2 : i32 to vector<8x1xi32>
    %41 = arith.addi %39, %40 : vector<8x1xi32>
    %42 = vector.broadcast %41 : vector<8x1xi32> to vector<8x128xi32>
    %43 = arith.cmpi eq, %1, %42 : vector<8x128xi32>
    %44 = arith.ori %38, %43 : vector<8x128xi1>
    %45 = vector.extract_strided_slice %0 {offsets = [0, 7], sizes = [8, 1], strides = [1, 1]} : vector<8x20xi32> to vector<8x1xi32>
    %c32_i32_3 = arith.constant 32 : i32
    %46 = vector.broadcast %c32_i32_3 : i32 to vector<8x1xi32>
    %47 = arith.addi %45, %46 : vector<8x1xi32>
    %48 = vector.broadcast %47 : vector<8x1xi32> to vector<8x128xi32>
    %49 = arith.cmpi eq, %1, %48 : vector<8x128xi32>
    %50 = arith.ori %44, %49 : vector<8x128xi1>
    %51 = vector.extract_strided_slice %0 {offsets = [0, 8], sizes = [8, 1], strides = [1, 1]} : vector<8x20xi32> to vector<8x1xi32>
    %c48_i32_4 = arith.constant 48 : i32
    %52 = vector.broadcast %c48_i32_4 : i32 to vector<8x1xi32>
    %53 = arith.addi %51, %52 : vector<8x1xi32>
    %54 = vector.broadcast %53 : vector<8x1xi32> to vector<8x128xi32>
    %55 = arith.cmpi eq, %1, %54 : vector<8x128xi32>
    %56 = arith.ori %50, %55 : vector<8x128xi1>
    %57 = vector.extract_strided_slice %0 {offsets = [0, 9], sizes = [8, 1], strides = [1, 1]} : vector<8x20xi32> to vector<8x1xi32>
    %c64_i32_5 = arith.constant 64 : i32
    %58 = vector.broadcast %c64_i32_5 : i32 to vector<8x1xi32>
    %59 = arith.addi %57, %58 : vector<8x1xi32>
    %60 = vector.broadcast %59 : vector<8x1xi32> to vector<8x128xi32>
    %61 = arith.cmpi eq, %1, %60 : vector<8x128xi32>
    %62 = arith.ori %56, %61 : vector<8x128xi1>
    %63 = arith.extui %62 : vector<8x128xi1> to vector<8x128xi32>
    %64 = arith.sitofp %63 : vector<8x128xi32> to vector<8x128xf32>
    %65 = arith.truncf %64 : vector<8x128xf32> to vector<8x128xbf16>
    %66 = vector.extract_strided_slice %0 {offsets = [0, 10], sizes = [8, 1], strides = [1, 1]} : vector<8x20xi32> to vector<8x1xi32>
    %c0_i32_6 = arith.constant 0 : i32
    %67 = vector.broadcast %c0_i32_6 : i32 to vector<8x1xi32>
    %68 = arith.addi %66, %67 : vector<8x1xi32>
    %69 = vector.broadcast %68 : vector<8x1xi32> to vector<8x128xi32>
    %70 = arith.cmpi eq, %1, %69 : vector<8x128xi32>
    %71 = vector.extract_strided_slice %0 {offsets = [0, 11], sizes = [8, 1], strides = [1, 1]} : vector<8x20xi32> to vector<8x1xi32>
    %c16_i32_7 = arith.constant 16 : i32
    %72 = vector.broadcast %c16_i32_7 : i32 to vector<8x1xi32>
    %73 = arith.addi %71, %72 : vector<8x1xi32>
    %74 = vector.broadcast %73 : vector<8x1xi32> to vector<8x128xi32>
    %75 = arith.cmpi eq, %1, %74 : vector<8x128xi32>
    %76 = arith.ori %70, %75 : vector<8x128xi1>
    %77 = vector.extract_strided_slice %0 {offsets = [0, 12], sizes = [8, 1], strides = [1, 1]} : vector<8x20xi32> to vector<8x1xi32>
    %c32_i32_8 = arith.constant 32 : i32
    %78 = vector.broadcast %c32_i32_8 : i32 to vector<8x1xi32>
    %79 = arith.addi %77, %78 : vector<8x1xi32>
    %80 = vector.broadcast %79 : vector<8x1xi32> to vector<8x128xi32>
    %81 = arith.cmpi eq, %1, %80 : vector<8x128xi32>
    %82 = arith.ori %76, %81 : vector<8x128xi1>
    %83 = vector.extract_strided_slice %0 {offsets = [0, 13], sizes = [8, 1], strides = [1, 1]} : vector<8x20xi32> to vector<8x1xi32>
    %c48_i32_9 = arith.constant 48 : i32
    %84 = vector.broadcast %c48_i32_9 : i32 to vector<8x1xi32>
    %85 = arith.addi %83, %84 : vector<8x1xi32>
    %86 = vector.broadcast %85 : vector<8x1xi32> to vector<8x128xi32>
    %87 = arith.cmpi eq, %1, %86 : vector<8x128xi32>
    %88 = arith.ori %82, %87 : vector<8x128xi1>
    %89 = vector.extract_strided_slice %0 {offsets = [0, 14], sizes = [8, 1], strides = [1, 1]} : vector<8x20xi32> to vector<8x1xi32>
    %c64_i32_10 = arith.constant 64 : i32
    %90 = vector.broadcast %c64_i32_10 : i32 to vector<8x1xi32>
    %91 = arith.addi %89, %90 : vector<8x1xi32>
    %92 = vector.broadcast %91 : vector<8x1xi32> to vector<8x128xi32>
    %93 = arith.cmpi eq, %1, %92 : vector<8x128xi32>
    %94 = arith.ori %88, %93 : vector<8x128xi1>
    %95 = arith.extui %94 : vector<8x128xi1> to vector<8x128xi32>
    %96 = arith.sitofp %95 : vector<8x128xi32> to vector<8x128xf32>
    %97 = arith.truncf %96 : vector<8x128xf32> to vector<8x128xbf16>
    %98 = vector.extract_strided_slice %0 {offsets = [0, 15], sizes = [8, 1], strides = [1, 1]} : vector<8x20xi32> to vector<8x1xi32>
    %c0_i32_11 = arith.constant 0 : i32
    %99 = vector.broadcast %c0_i32_11 : i32 to vector<8x1xi32>
    %100 = arith.addi %98, %99 : vector<8x1xi32>
    %101 = vector.broadcast %100 : vector<8x1xi32> to vector<8x128xi32>
    %102 = arith.cmpi eq, %1, %101 : vector<8x128xi32>
    %103 = vector.extract_strided_slice %0 {offsets = [0, 16], sizes = [8, 1], strides = [1, 1]} : vector<8x20xi32> to vector<8x1xi32>
    %c16_i32_12 = arith.constant 16 : i32
    %104 = vector.broadcast %c16_i32_12 : i32 to vector<8x1xi32>
    %105 = arith.addi %103, %104 : vector<8x1xi32>
    %106 = vector.broadcast %105 : vector<8x1xi32> to vector<8x128xi32>
    %107 = arith.cmpi eq, %1, %106 : vector<8x128xi32>
    %108 = arith.ori %102, %107 : vector<8x128xi1>
    %109 = vector.extract_strided_slice %0 {offsets = [0, 17], sizes = [8, 1], strides = [1, 1]} : vector<8x20xi32> to vector<8x1xi32>
    %c32_i32_13 = arith.constant 32 : i32
    %110 = vector.broadcast %c32_i32_13 : i32 to vector<8x1xi32>
    %111 = arith.addi %109, %110 : vector<8x1xi32>
    %112 = vector.broadcast %111 : vector<8x1xi32> to vector<8x128xi32>
    %113 = arith.cmpi eq, %1, %112 : vector<8x128xi32>
    %114 = arith.ori %108, %113 : vector<8x128xi1>
    %115 = vector.extract_strided_slice %0 {offsets = [0, 18], sizes = [8, 1], strides = [1, 1]} : vector<8x20xi32> to vector<8x1xi32>
    %c48_i32_14 = arith.constant 48 : i32
    %116 = vector.broadcast %c48_i32_14 : i32 to vector<8x1xi32>
    %117 = arith.addi %115, %116 : vector<8x1xi32>
    %118 = vector.broadcast %117 : vector<8x1xi32> to vector<8x128xi32>
    %119 = arith.cmpi eq, %1, %118 : vector<8x128xi32>
    %120 = arith.ori %114, %119 : vector<8x128xi1>
    %121 = vector.extract_strided_slice %0 {offsets = [0, 19], sizes = [8, 1], strides = [1, 1]} : vector<8x20xi32> to vector<8x1xi32>
    %c64_i32_15 = arith.constant 64 : i32
    %122 = vector.broadcast %c64_i32_15 : i32 to vector<8x1xi32>
    %123 = arith.addi %121, %122 : vector<8x1xi32>
    %124 = vector.broadcast %123 : vector<8x1xi32> to vector<8x128xi32>
    %125 = arith.cmpi eq, %1, %124 : vector<8x128xi32>
    %126 = arith.ori %120, %125 : vector<8x128xi1>
    %127 = arith.extui %126 : vector<8x128xi1> to vector<8x128xi32>
    %128 = arith.sitofp %127 : vector<8x128xi32> to vector<8x128xf32>
    %129 = arith.truncf %128 : vector<8x128xf32> to vector<8x128xbf16>
    %130 = tpu.concatenate %33, %65, %97, %129 in 1 : vector<8x128xbf16>, vector<8x128xbf16>, vector<8x128xbf16>, vector<8x128xbf16> -> vector<8x512xbf16>
    %c0_16 = arith.constant 0 : index
    %c0_17 = arith.constant 0 : index
    %131 = vector.load %arg2[%c0_16, %c0_17] : memref<512x128xbf16, #tpu.memory_space<vmem>>, vector<512x128xbf16>
    %cst = arith.constant dense<0.000000e+00> : vector<8x128xf32>
    %132 = tpu.matmul %130, %131, %cst {dimension_numbers = #tpu.dot_dimension_numbers<[1], [0], [0], [1], [0, 0, 1, 1], [], []>} : vector<8x512xbf16>, vector<512x128xbf16>, vector<8x128xf32> -> vector<8x128xf32>
    %c0_18 = arith.constant 0 : index
    %c0_19 = arith.constant 0 : index
    %133 = vector.load %arg3[%c0_18, %c0_19] : memref<8x128xf32, #tpu.memory_space<vmem>>, vector<8x128xf32>
    tpu.vector_store %arg3[%c0_18, %c0_19], %132 {strides = array<i32>} : memref<8x128xf32, #tpu.memory_space<vmem>>, vector<8x128xf32>,
    return
  }
  func.func @transform_0(%arg0: i32) -> (i32, i32) {
    %c0_i32 = arith.constant 0 : i32
    %c0_i32_0 = arith.constant 0 : i32
    return %arg0, %c0_i32 : i32, i32
  }
  func.func @transform_1(%arg0: i32) -> (i32, i32) {
    %c0_i32 = arith.constant 0 : i32
    %c0_i32_0 = arith.constant 0 : i32
    %c0_i32_1 = arith.constant 0 : i32
    return %c0_i32, %c0_i32_0 : i32, i32
  }
  func.func @transform_2(%arg0: i32) -> (i32, i32) {
    %c0_i32 = arith.constant 0 : i32
    %c0_i32_0 = arith.constant 0 : i32
    return %arg0, %c0_i32 : i32, i32
  }
}

</mosaic_0001>

<bundles_post_ra>
// kernel: tpu_custom_call.1
= control target key start
LH: loop header
LB: loop body
LE: loop exit
PB: predicated region body
PF: predicated region fallthrough
CT: control target
= control target key end

     0   :  { %7 = vsyncpa [#allocation3], 0  ;;  %s833_s0 = inlined_call_operand.hbm [shape: s32[8,20], index: 0, kind: input, shape index: {}]   ;;  %s834_s1 = inlined_call_operand.hbm [shape: bf16[512,128], index: 1, kind: input, shape index: {}]   ;;  %s835_s2 = inlined_call_operand.hbm [shape: f32[8,128], index: 2, kind: output, shape index: {}]  }
   0x1   :  { %8 = vsyncpa [#allocation6], 0 }
   0x2   :  { %9 = vsyncpa [#allocation4], 0  ;;  %s737_s9 = smov [#allocation2]   ;;  %s738_s11 = smov [#allocation5]  }
   0x3   :  { %s16_s10 = sshll.u32 %s737_s9, 4  ;;  %s25_s12 = sshll.u32 %s738_s11, 4  ;;  %s17_s10 = int_to_ptr.vmem [resolvable:$true] %s16_s10  ;;  %s778_s12 = int_to_ptr.vmem [resolvable:$true] %s25_s12 }
   0x4   :  { %s665_s15 = scalar_lea.hbm %s833_s0, 128 }
   0x5   :  { %p666_p0 = scmp.ne.s32.totalorder %s833_s0, %s665_s15  ;;  %p669_p1 = scmp.lt.u32.totalorder %s665_s15, %s833_s0 }
   0x7   :  { %p671_p2 = pnand %p669_p1, %p666_p0 }
   0x9   :  { %674 = shalt.err (!%p671_p2)
}
   0xa   :  { %s675_s20 = scalar_lea.vmem %s17_s10, 128  ;;  %p680_p4 = scmp.lt.s32.totalorder %s17_s10, %s17_s10 }
   0xb   :  { %p676_p3 = scmp.ne.s32.totalorder %s17_s10, %s675_s20  ;;  %p681_p5 = scmp.lt.s32.totalorder %s675_s20, %s675_s20 }
   0xd   :  { %p682_p6 = por %p681_p5, %p680_p4 }
   0xf   :  { %p683_p7 = pnand %p682_p6, %p676_p3 }
  0x11   :  { %686 = shalt.err (!%p683_p7)
}
  0x12   :  { %19 = dma.hbm_to_vmem [thread:$0]  %s833_s0, 128, %s17_s10, [#allocation3]  }
  0x13   :  { %s687_s25 = scalar_lea.hbm %s834_s1, 4096 }
  0x14   :  { %p688_p8 = scmp.ne.s32.totalorder %s834_s1, %s687_s25  ;;  %p691_p9 = scmp.lt.u32.totalorder %s687_s25, %s834_s1 }
  0x16   :  { %p693_p10 = pnand %p691_p9, %p688_p8 }
  0x18   :  { %696 = shalt.err (!%p693_p10)
}
  0x19   :  { %s697_s30 = scalar_lea.vmem %s778_s12, 4096  ;;  %p702_p12 = scmp.lt.s32.totalorder %s778_s12, %s778_s12 }
  0x1a   :  { %p698_p11 = scmp.ne.s32.totalorder %s778_s12, %s697_s30  ;;  %p703_p13 = scmp.lt.s32.totalorder %s697_s30, %s697_s30 }
  0x1c   :  { %p704_p0 = por %p703_p13, %p702_p12 }
  0x1e   :  { %p705_p1 = pnand %p704_p0, %p698_p11 }
  0x20   :  { %708 = shalt.err (!%p705_p1)
}
  0x21   :  { %s739_s0 = smov 64   ;;  %s740_s3 = smov 4  }
  0x22   :  { %31 = dma.hbm_to_vmem [thread:$0]  %s834_s1, 4096, %s778_s12, [#allocation6], %s739_s0, %s739_s0, %s740_s3  }
  0x23   :  { %731 = dma.done.wait [#allocation3], 128  }
  0x24   :  { %732 = vsyncadd [#allocation3], 4294967168 }
  0x25   :  { %733 = dma.done.wait [#allocation6], 4096  }
  0x26   :  { %734 = vsyncadd [#allocation6], 4294963200  ;;  %v741_v0 = vmov 15   ;;  %v742_v1 = vmov 5   ;;  %v39_v2 = vld [vmem:[#allocation2] sm:$0xff]  ;;  %v743_v6 = vmov 0  }
  0x27   :  { %614 = vset.pattern.permute.xlu1 %v741_v0  ;;  %613 = vset.pattern.permute.xlu0 %v742_v1  ;;  %v46_v3 = vadd.s32 16, %v39_v2  ;;  %v52_v4 = vadd.s32 32, %v39_v2  ;;  %v809_v5 = vadd.s32 48, %v39_v2  ;;  %v744_v7 = vmov 6   ;;  %v633_v17 = vld [vmem:[#allocation5 + $0x40] sm:$0xff]   ;;  %v635_v21 = vld [vmem:[#allocation5 + $0x48] sm:$0xff]  }
  0x28   :  { %128 = vperm.xlu1 %614, %v39_v2   ;;  %74 = vperm.xlu0 %613, %v39_v2   ;;  %v745_v8 = vmov 16   ;;  %v746_v9 = vmov 1   ;;  %v747_v10 = vmov 7   ;;  %v748_v11 = vmov 11   ;;  %v634_v18 = vld [vmem:[#allocation5] sm:$0xff]   ;;  %v636_v22 = vld [vmem:[#allocation5 + $0x8] sm:$0xff]  }
  0x29   :  { %v749_v12 = vmov 10   ;;  %v750_v13 = vmov 8   ;;  %v751_v14 = vmov 17   ;;  %v752_v15 = vmov 3   ;;  %543 = vmatprep.subr.bf16.mxu0 %v633_v17  ;;  %v637_v23 = vld [vmem:[#allocation5 + $0xc0] sm:$0xff]   ;;  %v639_v26 = vld [vmem:[#allocation5 + $0x50] sm:$0xff]  }
  0x2a   :  { %v813_v16 = vadd.s32 64, %v39_v2  ;;  %v753_v19 = vmov 2   ;;  %v754_v20 = vmov 19   ;;  %544 = vmatpush3.bf16.msra.mxu0 %v634_v18  ;;  %v638_v24 = vld [vmem:[#allocation5 + $0x80] sm:$0xff]   ;;  %v755_v25 = vmov 12   ;;  %565 = vmatprep.subr.bf16.mxu1 %v637_v23  ;;  %v640_v27 = vld [vmem:[#allocation5 + $0x10] sm:$0xff]  }
  0x2b   :  { %545 = vmatprep.subr.bf16.mxu0 %v635_v21  ;;  %566 = vmatpush3.bf16.msra.mxu1 %v638_v24  ;;  %v641_v28 = vld [vmem:[#allocation5 + $0xc8] sm:$0xff]   ;;  %v756_v30 = vmov 18   ;;  %v643_v31 = vld [vmem:[#allocation5 + $0x58] sm:$0xff]   ;;  %v645_v33 = vld [vmem:[#allocation5 + $0xd0] sm:$0xff]   ;;  %v757_v36 = vmov 9   ;;  %v758_v43 = vmov 13  }
  0x2c   :  { %615 = vset.pattern.permute.xlu1 %v743_v6  ;;  %616 = vset.pattern.permute.xlu0 %v744_v7  ;;  %v642_v29 = vld [vmem:[#allocation5 + $0x88] sm:$0xff]   ;;  %v644_v32 = vld [vmem:[#allocation5 + $0x18] sm:$0xff]   ;;  %v646_v34 = vld [vmem:[#allocation5 + $0x90] sm:$0xff]   ;;  %v759_v49 = vmov 4   ;;  %v760_v54 = vmov 14   ;;  %s762_s1 = smov [#allocation7]  }
  0x2d   :  { %43 = vperm.xlu1 %615, %v39_v2   ;;  %78 = vperm.xlu0 %616, %v46_v3   ;;  %v647_v35 = vld [vmem:[#allocation5 + $0x60] sm:$0xff]   ;;  %v649_v38 = vld [vmem:[#allocation5 + $0xd8] sm:$0xff]   ;;  %v651_v40 = vld [vmem:[#allocation5 + $0x68] sm:$0xff]   ;;  %s497_s6 = sshll.u32 %s762_s1, 4  ;;  %s498_s6 = int_to_ptr.vmem [resolvable:$true] %s497_s6 }
  0x2e   :  { %546 = vmatpush3.bf16.msra.mxu0 %v636_v22  ;;  %567 = vmatprep.subr.bf16.mxu1 %v641_v28  ;;  %v648_v37 = vld [vmem:[#allocation5 + $0x20] sm:$0xff]   ;;  %v650_v39 = vld [vmem:[#allocation5 + $0x98] sm:$0xff]   ;;  %v652_v42 = vld [vmem:[#allocation5 + $0x28] sm:$0xff]   ;;  %s709_s7 = scalar_lea.vmem %s498_s6, 128  ;;  %p714_p3 = scmp.lt.s32.totalorder %s498_s6, %s498_s6 }
  0x2f   :  { %547 = vmatprep.subr.bf16.mxu0 %v639_v26  ;;  %568 = vmatpush3.bf16.msra.mxu1 %v642_v29  ;;  %v653_v41 = vld [vmem:[#allocation5 + $0xe0] sm:$0xff]   ;;  %v655_v45 = vld [vmem:[#allocation5 + $0x70] sm:$0xff]   ;;  %v657_v47 = vld [vmem:[#allocation5 + $0xe8] sm:$0xff]   ;;  %p710_p2 = scmp.ne.s32.totalorder %s498_s6, %s709_s7  ;;  %p715_p4 = scmp.lt.s32.totalorder %s709_s7, %s709_s7 }
  0x30   :  { %569 = vmatprep.subr.bf16.mxu1 %v645_v33  ;;  %v654_v44 = vld [vmem:[#allocation5 + $0xa0] sm:$0xff]   ;;  %v656_v46 = vld [vmem:[#allocation5 + $0x30] sm:$0xff]   ;;  %v658_v48 = vld [vmem:[#allocation5 + $0xa8] sm:$0xff]  }
  0x31   :  { %617 = vset.pattern.permute.xlu1 %v745_v8  ;;  %618 = vset.pattern.permute.xlu0 %v746_v9  ;;  %v659_v50 = vld [vmem:[#allocation5 + $0x78] sm:$0xff]   ;;  %v661_v52 = vld [vmem:[#allocation5 + $0xf0] sm:$0xff]   ;;  %p716_p5 = por %p715_p4, %p714_p3 }
  0x32   :  { %132 = vperm.xlu1 %617, %v46_v3   ;;  %48 = vperm.xlu0 %618, %v46_v3   ;;  %v660_v51 = vld [vmem:[#allocation5 + $0x38] sm:$0xff]   ;;  %v662_v53 = vld [vmem:[#allocation5 + $0xb0] sm:$0xff]  }
  0x33   :  { %548 = vmatpush3.bf16.msra.mxu0 %v640_v27  ;;  %570 = vmatpush3.bf16.msra.mxu1 %v646_v34  ;;  %v663_v55 = vld [vmem:[#allocation5 + $0xf8] sm:$0xff]   ;;  %p717_p6 = pnand %p716_p5, %p710_p2 }
  0x34   :  { %549 = vmatprep.subr.bf16.mxu0 %v643_v31  ;;  %571 = vmatprep.subr.bf16.mxu1 %v649_v38  ;;  %v664_v56 = vld [vmem:[#allocation5 + $0xb8] sm:$0xff]  }
  0x36   :  { %619 = vset.pattern.permute.xlu1 %v747_v10  ;;  %621 = vset.pattern.permute.xlu0 %v748_v11  ;;  %v761_v11 = vmov 0.0  }
  0x37   :  { %83 = vperm.xlu1 %619, %v52_v4   ;;  %105 = vperm.xlu0 %621, %v46_v3  }
  0x38   :  { %550 = vmatpush3.bf16.msra.mxu0 %v644_v32  ;;  %572 = vmatpush3.bf16.msra.mxu1 %v650_v39 }
  0x39   :  { %551 = vmatprep.subr.bf16.mxu0 %v647_v35  ;;  %573 = vmatprep.subr.bf16.mxu1 %v653_v41 }
  0x3b   :  { %620 = vset.pattern.permute.xlu1 %v749_v12  ;;  %624 = vset.pattern.permute.xlu0 %v750_v13 }
  0x3c   :  { %101 = vperm.xlu1 %620, %v39_v2   ;;  %88 = vperm.xlu0 %624, %v809_v5  }
  0x3d   :  { %552 = vmatpush3.bf16.msra.mxu0 %v648_v37  ;;  %574 = vmatpush3.bf16.msra.mxu1 %v654_v44 }
  0x3e   :  { %553 = vmatprep.subr.bf16.mxu0 %v651_v40  ;;  %575 = vmatprep.subr.bf16.mxu1 %v657_v47 }
  0x40   :  { %622 = vset.pattern.permute.xlu1 %v751_v14  ;;  %627 = vset.pattern.permute.xlu0 %v752_v15 }
  0x41   :  { %137 = vperm.xlu1 %622, %v52_v4   ;;  %60 = vperm.xlu0 %627, %v809_v5  }
  0x42   :  { %554 = vmatpush3.bf16.msra.mxu0 %v652_v42  ;;  %576 = vmatpush3.bf16.msra.mxu1 %v658_v48 }
  0x43   :  { %555 = vmatprep.subr.bf16.mxu0 %v655_v45  ;;  %577 = vmatprep.subr.bf16.mxu1 %v661_v52 }
  0x45   :  { %623 = vset.pattern.permute.xlu1 %v753_v19  ;;  %630 = vset.pattern.permute.xlu0 %v754_v20 }
  0x46   :  { %54 = vperm.xlu1 %623, %v52_v4   ;;  %147 = vperm.xlu0 %630, %v813_v16  }
  0x47   :  { %556 = vmatpush3.bf16.msra.mxu0 %v656_v46  ;;  %578 = vmatpush3.bf16.msra.mxu1 %v662_v53 }
  0x48   :  { %557 = vmatprep.subr.bf16.mxu0 %v659_v50  ;;  %579 = vmatprep.subr.bf16.mxu1 %v663_v55 }
  0x4a   :  { %625 = vset.pattern.permute.xlu1 %v755_v25 }
  0x4b   :  { %110 = vperm.xlu1 %625, %v52_v4   ;;  %558 = vmatpush3.bf16.msra.mxu0 %v660_v51  ;;  %v40_v4 = vlaneseq }
  0x4c   :  { %580 = vmatpush3.bf16.msra.mxu1 %v664_v56 }
  0x4d   :  { %v41_v7 = vand.u32 127, %v40_v4 }
  0x4f   :  { %626 = vset.pattern.permute.xlu1 %v756_v30 }
  0x50   :  { %142 = vperm.xlu1 %626, %v809_v5  }
  0x54   :  { %628 = vset.pattern.permute.xlu1 %v757_v36 }
  0x55   :  { %93 = vperm.xlu1 %628, %v813_v16  }
  0x59   :  { %629 = vset.pattern.permute.xlu1 %v758_v43 }
  0x5a   :  { %115 = vperm.xlu1 %629, %v809_v5  }
  0x5e   :  { %631 = vset.pattern.permute.xlu1 %v759_v49 }
  0x5f   :  { %66 = vperm.xlu1 %631, %v813_v16  }
  0x63   :  { %632 = vset.pattern.permute.xlu1 %v760_v54 }
  0x64   :  { %120 = vperm.xlu1 %632, %v813_v16  }
  0xa7   :  { %v129_v57 = vpop.permute.xlu1 %128  ;;  %v75_v59 = vpop.permute.xlu0 %74 }
  0xa8   :  { %vm76_vm0 = vcmp.eq.s32.totalorder %v41_v7, %v75_v59  ;;  %vm130_vm4 = vcmp.eq.s32.totalorder %v41_v7, %v129_v57 }
  0xac   :  { %v44_v58 = vpop.permute.xlu1 %43  ;;  %v79_v61 = vpop.permute.xlu0 %78 }
  0xad   :  { %vm80_vm1 = vcmp.eq.s32.totalorder %v41_v7, %v79_v61 }
  0xae   :  { %vm81_vm5 = vmor %vm76_vm0, %vm80_vm1 }
  0xb1   :  { %v133_v60 = vpop.permute.xlu1 %132  ;;  %v49_v63 = vpop.permute.xlu0 %48 }
  0xb2   :  { %vm134_vm2 = vcmp.eq.s32.totalorder %v41_v7, %v133_v60 }
  0xb3   :  { %vm135_vm6 = vmor %vm130_vm4, %vm134_vm2  ;;  %vm50_vm2 = vcmp.eq.s32.totalorder %v41_v7, %v49_v63 }
  0xb6   :  { %v84_v62 = vpop.permute.xlu1 %83  ;;  %v106_v1 = vpop.permute.xlu0 %105 }
  0xb7   :  { %vm85_vm10 = vcmp.eq.s32.totalorder %v41_v7, %v84_v62 }
  0xb8   :  { %vm86_vm14 = vmor %vm81_vm5, %vm85_vm10 }
  0xbb   :  { %v102_v0 = vpop.permute.xlu1 %101  ;;  %v89_v3 = vpop.permute.xlu0 %88 }
  0xbc   :  { %vm90_vm12 = vcmp.eq.s32.totalorder %v41_v7, %v89_v3 }
  0xbd   :  { %vm91_vm15 = vmor %vm86_vm14, %vm90_vm12 }
  0xc0   :  { %v138_v2 = vpop.permute.xlu1 %137  ;;  %v61_v6 = vpop.permute.xlu0 %60 }
  0xc1   :  { %vm139_vm3 = vcmp.eq.s32.totalorder %v41_v7, %v138_v2 }
  0xc2   :  { %vm140_vm8 = vmor %vm135_vm6, %vm139_vm3  ;;  %vm45_vm3 = vcmp.eq.s32.totalorder %v41_v7, %v44_v58 }
  0xc3   :  { %vm51_vm6 = vmor %vm45_vm3, %vm50_vm2 }
  0xc5   :  { %v55_v5 = vpop.permute.xlu1 %54  ;;  %v148_v9 = vpop.permute.xlu0 %147 }
  0xc6   :  { %vm149_vm7 = vcmp.eq.s32.totalorder %v41_v7, %v148_v9  ;;  %vm56_vm4 = vcmp.eq.s32.totalorder %v41_v7, %v55_v5 }
  0xca   :  { %v111_v8 = vpop.permute.xlu1 %110 }
  0xcf   :  { %v143_v10 = vpop.permute.xlu1 %142 }
  0xd0   :  { %vm144_vm9 = vcmp.eq.s32.totalorder %v41_v7, %v143_v10 }
  0xd1   :  { %vm145_vm11 = vmor %vm140_vm8, %vm144_vm9  ;;  %vm62_vm9 = vcmp.eq.s32.totalorder %v41_v7, %v61_v6 }
  0xd2   :  { %vm150_vm13 = vmor %vm145_vm11, %vm149_vm7  ;;  %vm107_vm7 = vcmp.eq.s32.totalorder %v41_v7, %v106_v1  ;;  %vm103_vm11 = vcmp.eq.s32.totalorder %v41_v7, %v102_v0 }
  0xd3   :  { %v510_v12 = vsel %vm150_vm13, 1.0, %v761_v11  ;;  %vm57_vm8 = vmor %vm51_vm6, %vm56_vm4  ;;  %vm112_vm13 = vcmp.eq.s32.totalorder %v41_v7, %v111_v8 }
  0xd4   :  { %v94_v13 = vpop.permute.xlu1 %93  ;;  %v153_v14 = vpack.c.bf16 %v510_v12, %v510_v12  ;;  %vm63_vm5 = vmor %vm57_vm8, %vm62_vm9 }
  0xd5   :  { %vm95_vm0 = vcmp.eq.s32.totalorder %v41_v7, %v94_v13 }
  0xd6   :  { %482 = vmatprep.mubr.bf16.mxu1 %v153_v14  ;;  %vm96_vm1 = vmor %vm91_vm15, %vm95_vm0 }
  0xd7   :  { %v508_v15 = vsel %vm96_vm1, 1.0, %v761_v11  ;;  %vm108_vm15 = vmor %vm103_vm11, %vm107_vm7 }
  0xd8   :  { %v99_v16 = vpack.c.bf16 %v508_v15, %v508_v15  ;;  %vm113_vm0 = vmor %vm108_vm15, %vm112_vm13 }
  0xd9   :  { %v116_v17 = vpop.permute.xlu1 %115 }
  0xda   :  { %442 = vmatprep.mubr.bf16.mxu0 %v99_v16  ;;  %vm117_vm14 = vcmp.eq.s32.totalorder %v41_v7, %v116_v17 }
  0xdb   :  { %vm118_vm1 = vmor %vm113_vm0, %vm117_vm14 }
  0xde   :  { %v67_v18 = vpop.permute.xlu1 %66 }
  0xdf   :  { %vm68_vm10 = vcmp.eq.s32.totalorder %v41_v7, %v67_v18 }
  0xe0   :  { %vm69_vm12 = vmor %vm63_vm5, %vm68_vm10 }
  0xe1   :  { %v507_v19 = vsel %vm69_vm12, 1.0, %v761_v11 }
  0xe2   :  { %v72_v20 = vpack.c.bf16 %v507_v19, %v507_v19 }
  0xe3   :  { %v121_v21 = vpop.permute.xlu1 %120 }
  0xe4   :  { %vm122_vm2 = vcmp.eq.s32.totalorder %v41_v7, %v121_v21  ;;  %443 = vmatmul.mubr.bf16.vlgmr.msra.gmra.mrb[0].mxu0 %v72_v20 }
  0xe5   :  { %vm123_vm3 = vmor %vm118_vm1, %vm122_vm2 }
  0xe6   :  { %v509_v22 = vsel %vm123_vm3, 1.0, %v761_v11 }
  0xe7   :  { %v126_v23 = vpack.c.bf16 %v509_v22, %v509_v22 }
  0xe9   :  { %483 = vmatmul.mubr.bf16.vlgmr.msra.gmra.mrb[0].mxu1 %v126_v23 }
 0x1b7   :  { %v559_v24 = vpop.f32.mrb[0].mxu0 }
 0x1b8   :  { %v560_v25 = vpop.f32.mrb[1].mxu0 }
 0x1b9   :  { %v561_v26 = vadd.f32 %v560_v25, %v559_v24  ;;  %v562_v27 = vpop.f32.mrb[2].mxu0 }
 0x1ba   :  { %v563_v28 = vpop.f32.mrb[3].mxu0 }
 0x1bc   :  { %v581_v29 = vpop.f32.mrb[0].mxu1 }
 0x1bd   :  { %v582_v30 = vpop.f32.mrb[1].mxu1 }
 0x1be   :  { %v583_v31 = vadd.f32 %v582_v30, %v581_v29  ;;  %v584_v32 = vpop.f32.mrb[2].mxu1 }
 0x1bf   :  { %v585_v33 = vpop.f32.mrb[3].mxu1 }
 0x1c0   :  { %v485_v34 = vadd.f32 %v583_v31, %v561_v26 }
 0x1c2   :  { %490 = vst [vmem:[#allocation7] sm:$0xff] %v485_v34 }
 0x1c3   :  { %720 = shalt.err (!%p717_p6)
}
 0x1c4   :  { %s721_s10 = scalar_lea.hbm %s835_s2, 128 }
 0x1c5   :  { %p722_p7 = scmp.ne.s32.totalorder %s835_s2, %s721_s10  ;;  %p725_p8 = scmp.lt.u32.totalorder %s721_s10, %s835_s2 }
 0x1c7   :  { %p727_p9 = pnand %p725_p8, %p722_p7 }
 0x1c9   :  { %730 = shalt.err (!%p727_p9)
}
 0x1ca   :  { %500 = dma.vmem_to_hbm [thread:$0]  %s498_s6, 128, %s835_s2, [#allocation4]  }
 0x1cb   :  { %735 = dma.done.wait [#allocation4], 128  }
 0x1cc   :  { %736 = vsyncadd [#allocation4], 4294967168 }
 0x1cd   :  { %504 = vsyncpa [#allocation3], 1 }
 0x1ce   :  { %505 = vsyncpa [#allocation6], 1 }
 0x1cf   :  { %506 = vsyncpa [#allocation4], 1 }

</bundles_post_ra>
